<compile_context>
chip_gen: v5e
topology: v5e:2x2
jax: 0.10.0
libtpu: 0.0.40
codegen_flags: <defaults>
</compile_context>

<pallas_src>
import jax
import jax.numpy as jnp
from jax.experimental import pallas as pl
from jax.experimental.pallas import tpu as pltpu

LANE = 128
SUBLANE = 8


def mine_kernel(x_ref, w1_ref, b1_ref, w2_ref, b2_ref,
                w3_ref, b3_ref, w4_ref, b4_ref, o_ref):
    cdt = w1_ref.dtype                        # MXU operand dtype (bf16 default)
    x = x_ref[...].astype(cdt)                # (TB, In)

    # fc1 / fc2: MXU matmul with f32 accumulation; bias-add + ReLU in f32 in
    # registers, then the stored (TB, Hp) intermediate is materialized in bf16
    # to halve VMEM load/store traffic (vst is the likely binding slot on v5e).
    h = jnp.dot(x, w1_ref[...], preferred_element_type=jnp.float32)
    h = jnp.maximum(h + b1_ref[...], 0.0).astype(cdt)
    h = jnp.dot(h, w2_ref[...], preferred_element_type=jnp.float32)
    h = jnp.maximum(h + b2_ref[...], 0.0).astype(cdt)

    # fc3 epilogue fused with the fc4 weight multiply: relu(dot3 + b3) * w4 in
    # a single f32 VPU pass (no separate relu(h3) / contrib temporaries).
    h = jnp.dot(h, w3_ref[...], preferred_element_type=jnp.float32)
    h3w = jnp.maximum(h + b3_ref[...], 0.0) * w4_ref[...]       # (TB, Hp) f32

    # fc4 (out_features = 1): cross-lane (XLU) reduction instead of an N=1 MXU
    # matmul; the batch tile is folded to (rows, LANE) so the output store is
    # lane-dense (unmasked vst).  The wrapper reshapes back to (B, 1).
    rows, lane = o_ref.shape
    hp = h3w.shape[-1]
    out = jnp.sum(h3w.reshape(rows, lane, hp), axis=-1) + b4_ref[...]
    o_ref[...] = out.astype(o_ref.dtype)


def _pick_block_batch(batch):
    """Batch-tile heuristic: big enough to amortize per-grid-step overhead,
    small enough to stay well under v7x's 64 MiB VMEM, and sized so >= 2 tiles
    exist (megacore sharding) whenever there is enough work for two cores."""
    if batch <= 1024:
        # Single tile == full array, so (8,128) divisibility is waived; just
        # round up to a whole vreg row.
        return max(LANE, pl.cdiv(batch, LANE) * LANE)
    half = pl.cdiv(batch, 2)
    tb = pl.cdiv(half, 1024) * 1024           # keep rows_per_tile % 8 == 0
    return min(8192, tb)                       # 8192 rows ~ 20-28 MiB/step


def mine_forward(x, params, *, block_batch=None):
    """Forward pass. `params` are the padded/packed params from pad_params().
    `x` may be f32 or bf16 (cast to the compute dtype happens in-kernel)."""
    (w1, b1, w2, b2, w3, b3, w4, b4) = params
    B, in_dim = x.shape
    hp = w1.shape[1]
    tb = _pick_block_batch(B) if block_batch is None else block_batch
    assert tb % LANE == 0 and hp % LANE == 0

    b_pad = pl.cdiv(B, tb) * tb
    if b_pad != B:
        x = jnp.pad(x, ((0, b_pad - B), (0, 0)))
    n_tiles = b_pad // tb
    rows_per_tile = tb // LANE
    assert n_tiles == 1 or rows_per_tile % SUBLANE == 0

    def full(a):
        # Full-array block, constant index_map -> VMEM-resident across the grid
        # (DMA'd once).
        return pl.BlockSpec(a.shape, lambda i: (0, 0))

    vmem_limit = (48 if tb >= 4096 else 32) * 1024 * 1024

    out2d = pl.pallas_call(
        mine_kernel,
        out_shape=jax.ShapeDtypeStruct((b_pad // LANE, LANE), jnp.float32),
        grid=(n_tiles,),
        in_specs=[
            pl.BlockSpec((tb, in_dim), lambda i: (i, 0)),   # x: batch-tiled
            full(w1), full(b1), full(w2), full(b2),
            full(w3), full(b3), full(w4), full(b4),
        ],
        out_specs=pl.BlockSpec((rows_per_tile, LANE), lambda i: (i, 0)),
        compiler_params=pltpu.CompilerParams(
            dimension_semantics=("parallel",),       # megacore-shard batch tiles
            vmem_limit_bytes=vmem_limit,
        ),
    )(x, w1, b1, w2, b2, w3, b3, w4, b4)

    # Lane-dense slab -> logical (B, 1) column.
    return out2d.reshape(-1)[:B].reshape(B, 1)


def init_params(key, input_size, hidden_size):
    """f32 params in [in, out] (transposed-vs-PyTorch) layout, matching the
    module's init: fc1..fc3 weights ~ N(0, 0.02), zero biases.  fc4's PyTorch
    default uniform init is approximated with the same deterministic normal
    (forward semantics unchanged)."""
    k1, k2, k3, k4, k5 = jax.random.split(key, 5)
    w1 = 0.02 * jax.random.normal(k1, (input_size, hidden_size), jnp.float32)
    b1 = jnp.zeros((1, hidden_size), jnp.float32)
    w2 = 0.02 * jax.random.normal(k2, (hidden_size, hidden_size), jnp.float32)
    b2 = jnp.zeros((1, hidden_size), jnp.float32)
    w3 = 0.02 * jax.random.normal(k3, (hidden_size, hidden_size), jnp.float32)
    b3 = jnp.zeros((1, hidden_size), jnp.float32)
    w4 = 0.02 * jax.random.normal(k4, (hidden_size, 1), jnp.float32)
    b4 = 0.02 * jax.random.normal(k5, (1, 1), jnp.float32)
    return (w1, b1, w2, b2, w3, b3, w4, b4)


def pad_params(params, compute_dtype=jnp.bfloat16):
    """Zero-pad the hidden dim to a multiple of 128 lanes and cast the MXU
    weights to the compute dtype.  Padding with zeros is exact; biases for the
    padded columns are zero so downstream math is unchanged."""
    (w1, b1, w2, b2, w3, b3, w4, b4) = params
    h = w1.shape[1]
    hp = pl.cdiv(h, LANE) * LANE

    def pad2(a, r, c):
        return jnp.pad(a, ((0, r - a.shape[0]), (0, c - a.shape[1])))

    w1p = pad2(w1, w1.shape[0], hp).astype(compute_dtype)
    b1p = pad2(b1, 1, hp)                          # f32: bias add / ReLU stay f32
    w2p = pad2(w2, hp, hp).astype(compute_dtype)
    b2p = pad2(b2, 1, hp)
    w3p = pad2(w3, hp, hp).astype(compute_dtype)
    b3p = pad2(b3, 1, hp)
    w4p = pad2(w4.T, 1, hp)                        # fc4 weights as f32 row (1, Hp)
    return (w1p, b1p, w2p, b2p, w3p, b3p, w4p, b4)


def reference_forward(x, params, compute_dtype=jnp.bfloat16):
    """Pure-JAX reference mirroring the kernel's mixed-precision policy."""
    (w1, b1, w2, b2, w3, b3, w4, b4) = params
    c = compute_dtype
    h = jnp.maximum(jnp.dot(x.astype(c), w1.astype(c),
                            preferred_element_type=jnp.float32) + b1, 0.0)
    h = jnp.maximum(jnp.dot(h.astype(c), w2.astype(c),
                            preferred_element_type=jnp.float32) + b2, 0.0)
    h = jnp.maximum(jnp.dot(h.astype(c), w3.astype(c),
                            preferred_element_type=jnp.float32) + b3, 0.0)
    return jnp.dot(h, w4) + b4


if __name__ == "__main__":
    key = jax.random.PRNGKey(0)
    kx, kp, kx2 = jax.random.split(key, 3)

    input_size, hidden_size = 16, 32
    params = init_params(kp, input_size, hidden_size)
    padded = pad_params(params, compute_dtype=jnp.bfloat16)

    # Case 1: tiny batch (single tile, auto tile size).
    batch = 8
    x = jax.random.normal(kx, (batch, input_size), jnp.float32)
    out = jax.block_until_ready(mine_forward(x, padded))
    ref = reference_forward(x, params)
    assert out.shape == (batch, 1)
    assert jnp.allclose(out, ref, atol=1e-4, rtol=1e-4), (
        "max abs err %s" % jnp.max(jnp.abs(out - ref)))

    # Case 2: multi-tile + batch-padding path (B > block_batch, B % 128 != 0).
    batch2 = 1300
    x2 = jax.random.normal(kx2, (batch2, input_size), jnp.float32)
    out2 = jax.block_until_ready(mine_forward(x2, padded, block_batch=1024))
    ref2 = reference_forward(x2, params)
    assert out2.shape == (batch2, 1)
    assert jnp.allclose(out2, ref2, atol=1e-4, rtol=1e-4), (
        "max abs err %s" % jnp.max(jnp.abs(out2 - ref2)))

    print("KERNEL_OK")
</pallas_src>

<mosaic_0001>
module attributes {stable_mosaic.version = 11 : i64} {
  func.func @mine_kernel(%arg0: i32, %arg1: memref<128x16xf32, #tpu.memory_space<vmem>>, %arg2: memref<16x128xbf16, #tpu.memory_space<vmem>>, %arg3: memref<1x128xf32, #tpu.memory_space<vmem>>, %arg4: memref<128x128xbf16, #tpu.memory_space<vmem>>, %arg5: memref<1x128xf32, #tpu.memory_space<vmem>>, %arg6: memref<128x128xbf16, #tpu.memory_space<vmem>>, %arg7: memref<1x128xf32, #tpu.memory_space<vmem>>, %arg8: memref<1x128xf32, #tpu.memory_space<vmem>>, %arg9: memref<1x1xf32, #tpu.memory_space<vmem>>, %arg10: memref<1x128xf32, #tpu.memory_space<vmem>>) attributes {dimension_semantics = [#tpu.dimension_semantics<parallel>], iteration_bounds = array<i64: 1>, scalar_prefetch = 0 : i64, scratch_operands = 0 : i64, tpu.core_type = #tpu.core_type<tc>, window_params = [{transform_indices = @transform_0, window_bounds = array<i64: 128, 16>}, {pipeline_mode = #tpu.pipeline_mode<synchronous>, transform_indices = @transform_1, window_bounds = array<i64: 16, 128>}, {pipeline_mode = #tpu.pipeline_mode<synchronous>, transform_indices = @transform_2, window_bounds = array<i64: 1, 128>}, {pipeline_mode = #tpu.pipeline_mode<synchronous>, transform_indices = @transform_3, window_bounds = array<i64: 128, 128>}, {pipeline_mode = #tpu.pipeline_mode<synchronous>, transform_indices = @transform_4, window_bounds = array<i64: 1, 128>}, {pipeline_mode = #tpu.pipeline_mode<synchronous>, transform_indices = @transform_5, window_bounds = array<i64: 128, 128>}, {pipeline_mode = #tpu.pipeline_mode<synchronous>, transform_indices = @transform_6, window_bounds = array<i64: 1, 128>}, {pipeline_mode = #tpu.pipeline_mode<synchronous>, transform_indices = @transform_7, window_bounds = array<i64: 1, 128>}, {pipeline_mode = #tpu.pipeline_mode<synchronous>, transform_indices = @transform_8, window_bounds = array<i64: 1, 1>}, {transform_indices = @transform_9, window_bounds = array<i64: 1, 128>}]} {
    %c0 = arith.constant 0 : index
    %c0_0 = arith.constant 0 : index
    %0 = vector.load %arg1[%c0, %c0_0] : memref<128x16xf32, #tpu.memory_space<vmem>>, vector<128x16xf32>
    %1 = arith.truncf %0 : vector<128x16xf32> to vector<128x16xbf16>
    %c0_1 = arith.constant 0 : index
    %c0_2 = arith.constant 0 : index
    %2 = vector.load %arg2[%c0_1, %c0_2] : memref<16x128xbf16, #tpu.memory_space<vmem>>, vector<16x128xbf16>
    %cst = arith.constant dense<0.000000e+00> : vector<128x128xf32>
    %3 = tpu.matmul %1, %2, %cst {dimension_numbers = #tpu.dot_dimension_numbers<[1], [0], [0], [1], [0, 0, 1, 1], [], []>} : vector<128x16xbf16>, vector<16x128xbf16>, vector<128x128xf32> -> vector<128x128xf32>
    %c0_3 = arith.constant 0 : index
    %c0_4 = arith.constant 0 : index
    %4 = vector.load %arg3[%c0_3, %c0_4] : memref<1x128xf32, #tpu.memory_space<vmem>>, vector<1x128xf32>
    %5 = vector.broadcast %4 : vector<1x128xf32> to vector<128x128xf32>
    %6 = arith.addf %3, %5 : vector<128x128xf32>
    %cst_5 = arith.constant 0.000000e+00 : f32
    %7 = vector.broadcast %cst_5 : f32 to vector<128x128xf32>
    %8 = arith.maximumf %6, %7 : vector<128x128xf32>
    %9 = arith.truncf %8 : vector<128x128xf32> to vector<128x128xbf16>
    %c0_6 = arith.constant 0 : index
    %c0_7 = arith.constant 0 : index
    %10 = vector.load %arg4[%c0_6, %c0_7] : memref<128x128xbf16, #tpu.memory_space<vmem>>, vector<128x128xbf16>
    %cst_8 = arith.constant dense<0.000000e+00> : vector<128x128xf32>
    %11 = tpu.matmul %9, %10, %cst_8 {dimension_numbers = #tpu.dot_dimension_numbers<[1], [0], [0], [1], [0, 0, 1, 1], [], []>} : vector<128x128xbf16>, vector<128x128xbf16>, vector<128x128xf32> -> vector<128x128xf32>
    %c0_9 = arith.constant 0 : index
    %c0_10 = arith.constant 0 : index
    %12 = vector.load %arg5[%c0_9, %c0_10] : memref<1x128xf32, #tpu.memory_space<vmem>>, vector<1x128xf32>
    %13 = vector.broadcast %12 : vector<1x128xf32> to vector<128x128xf32>
    %14 = arith.addf %11, %13 : vector<128x128xf32>
    %cst_11 = arith.constant 0.000000e+00 : f32
    %15 = vector.broadcast %cst_11 : f32 to vector<128x128xf32>
    %16 = arith.maximumf %14, %15 : vector<128x128xf32>
    %17 = arith.truncf %16 : vector<128x128xf32> to vector<128x128xbf16>
    %c0_12 = arith.constant 0 : index
    %c0_13 = arith.constant 0 : index
    %18 = vector.load %arg6[%c0_12, %c0_13] : memref<128x128xbf16, #tpu.memory_space<vmem>>, vector<128x128xbf16>
    %cst_14 = arith.constant dense<0.000000e+00> : vector<128x128xf32>
    %19 = tpu.matmul %17, %18, %cst_14 {dimension_numbers = #tpu.dot_dimension_numbers<[1], [0], [0], [1], [0, 0, 1, 1], [], []>} : vector<128x128xbf16>, vector<128x128xbf16>, vector<128x128xf32> -> vector<128x128xf32>
    %c0_15 = arith.constant 0 : index
    %c0_16 = arith.constant 0 : index
    %20 = vector.load %arg7[%c0_15, %c0_16] : memref<1x128xf32, #tpu.memory_space<vmem>>, vector<1x128xf32>
    %21 = vector.broadcast %20 : vector<1x128xf32> to vector<128x128xf32>
    %22 = arith.addf %19, %21 : vector<128x128xf32>
    %cst_17 = arith.constant 0.000000e+00 : f32
    %23 = vector.broadcast %cst_17 : f32 to vector<128x128xf32>
    %24 = arith.maximumf %22, %23 : vector<128x128xf32>
    %c0_18 = arith.constant 0 : index
    %c0_19 = arith.constant 0 : index
    %25 = vector.load %arg8[%c0_18, %c0_19] : memref<1x128xf32, #tpu.memory_space<vmem>>, vector<1x128xf32>
    %26 = vector.broadcast %25 : vector<1x128xf32> to vector<128x128xf32>
    %27 = arith.mulf %24, %26 : vector<128x128xf32>
    %28 = vector.shape_cast %27 : vector<128x128xf32> to vector<1x128x128xf32>
    %cst_20 = arith.constant dense<0.000000e+00> : vector<1x128xf32>
    %29 = vector.multi_reduction <add>, %28, %cst_20 [2] : vector<1x128x128xf32> to vector<1x128xf32>
    %c0_21 = arith.constant 0 : index
    %c0_22 = arith.constant 0 : index
    %30 = vector.load %arg9[%c0_21, %c0_22] : memref<1x1xf32, #tpu.memory_space<vmem>>, vector<1x1xf32>
    %31 = vector.broadcast %30 : vector<1x1xf32> to vector<1x128xf32>
    %32 = arith.addf %29, %31 : vector<1x128xf32>
    %c0_23 = arith.constant 0 : index
    %c0_24 = arith.constant 0 : index
    %33 = vector.load %arg10[%c0_23, %c0_24] : memref<1x128xf32, #tpu.memory_space<vmem>>, vector<1x128xf32>
    tpu.vector_store %arg10[%c0_23, %c0_24], %32 {strides = array<i32>} : memref<1x128xf32, #tpu.memory_space<vmem>>, vector<1x128xf32>,
    return
  }
  func.func @transform_0(%arg0: i32) -> (i32, i32) {
    %c0_i32 = arith.constant 0 : i32
    %c0_i32_0 = arith.constant 0 : i32
    return %arg0, %c0_i32 : i32, i32
  }
  func.func @transform_1(%arg0: i32) -> (i32, i32) {
    %c0_i32 = arith.constant 0 : i32
    %c0_i32_0 = arith.constant 0 : i32
    %c0_i32_1 = arith.constant 0 : i32
    return %c0_i32, %c0_i32_0 : i32, i32
  }
  func.func @transform_2(%arg0: i32) -> (i32, i32) {
    %c0_i32 = arith.constant 0 : i32
    %c0_i32_0 = arith.constant 0 : i32
    %c0_i32_1 = arith.constant 0 : i32
    return %c0_i32, %c0_i32_0 : i32, i32
  }
  func.func @transform_3(%arg0: i32) -> (i32, i32) {
    %c0_i32 = arith.constant 0 : i32
    %c0_i32_0 = arith.constant 0 : i32
    %c0_i32_1 = arith.constant 0 : i32
    return %c0_i32, %c0_i32_0 : i32, i32
  }
  func.func @transform_4(%arg0: i32) -> (i32, i32) {
    %c0_i32 = arith.constant 0 : i32
    %c0_i32_0 = arith.constant 0 : i32
    %c0_i32_1 = arith.constant 0 : i32
    return %c0_i32, %c0_i32_0 : i32, i32
  }
  func.func @transform_5(%arg0: i32) -> (i32, i32) {
    %c0_i32 = arith.constant 0 : i32
    %c0_i32_0 = arith.constant 0 : i32
    %c0_i32_1 = arith.constant 0 : i32
    return %c0_i32, %c0_i32_0 : i32, i32
  }
  func.func @transform_6(%arg0: i32) -> (i32, i32) {
    %c0_i32 = arith.constant 0 : i32
    %c0_i32_0 = arith.constant 0 : i32
    %c0_i32_1 = arith.constant 0 : i32
    return %c0_i32, %c0_i32_0 : i32, i32
  }
  func.func @transform_7(%arg0: i32) -> (i32, i32) {
    %c0_i32 = arith.constant 0 : i32
    %c0_i32_0 = arith.constant 0 : i32
    %c0_i32_1 = arith.constant 0 : i32
    return %c0_i32, %c0_i32_0 : i32, i32
  }
  func.func @transform_8(%arg0: i32) -> (i32, i32) {
    %c0_i32 = arith.constant 0 : i32
    %c0_i32_0 = arith.constant 0 : i32
    %c0_i32_1 = arith.constant 0 : i32
    return %c0_i32, %c0_i32_0 : i32, i32
  }
  func.func @transform_9(%arg0: i32) -> (i32, i32) {
    %c0_i32 = arith.constant 0 : i32
    %c0_i32_0 = arith.constant 0 : i32
    return %arg0, %c0_i32 : i32, i32
  }
}

</mosaic_0001>

<bundles_post_ra>
// kernel: tpu_custom_call.1
= control target key start
LH: loop header
LB: loop body
LE: loop exit
PB: predicated region body
PF: predicated region fallthrough
CT: control target
= control target key end

     0   :  { %s1050_s0 = inlined_call_operand.vmem [shape: f32[128,16], index: 0, kind: input, shape index: {}]   ;;  %s1051_s1 = inlined_call_operand.vmem [shape: bf16[16,128], index: 1, kind: input, shape index: {}]   ;;  %s1052_s2 = inlined_call_operand.vmem [shape: f32[1,128], index: 2, kind: input, shape index: {}]   ;;  %s1053_s3 = inlined_call_operand.vmem [shape: bf16[128,128], index: 3, kind: input, shape index: {}]   ;;  %s1054_s4 = inlined_call_operand.vmem [shape: f32[1,128], index: 4, kind: input, shape index: {}]   ;;  %s1055_s5 = inlined_call_operand.vmem [shape: bf16[128,128], index: 5, kind: input, shape index: {}]   ;;  %s1056_s6 = inlined_call_operand.vmem [shape: f32[1,128], index: 6, kind: input, shape index: {}]   ;;  %s1057_s7 = inlined_call_operand.vmem [shape: f32[1,128], index: 7, kind: input, shape index: {}]   ;;  %s1058_s8 = inlined_call_operand.<no memory space> [shape: f32[1,1], index: 8, kind: input, shape index: {}]   ;;  %s1059_s9 = inlined_call_operand.hbm [shape: f32[1,128], index: 9, kind: output, shape index: {}]  }
   0x1   :  { %v14_v0 = vstv %s1058_s8 }
   0x2   :  { %15 = vst [vmem:[#allocation2] sm:$0x1] %v14_v0 }
   0x3   :  { %v692_v1 = vld [vmem:[%s1051_s1] sm:$0xff]  ;;  %v37_v3 = vld [vmem:[%s1050_s0 + $0x8] sm:$0xff]  ;;  %vm72_vm0 = vcmask 130048  }
   0x4   :  { %v36_v2 = vld [vmem:[%s1050_s0] sm:$0xff]  ;;  %104 = vmatpush.bf16.msra.mxu0 %v692_v1 }
   0x5   :  { %v52_v4 = vpack.c.bf16 %v37_v3, %v36_v2 }
   0x6   :  { %16 = vsyncpa [#allocation4], 0  ;;  %v38_v5 = vld [vmem:[%s1050_s0 + $0x10] sm:$0xff]  ;;  %v39_v6 = vld [vmem:[%s1050_s0 + $0x18] sm:$0xff]  ;;  %vm540_vm1 = vcmask 130112   ;;  %vm544_vm2 = vcmask 195712  }
   0x7   :  { %620 = vmatmul.msk.bf16.vlgmr.msra.gmra.mxu0 %vm72_vm0, %v52_v4  ;;  %v53_v7 = vpack.c.bf16 %v39_v6, %v38_v5  ;;  %v40_v8 = vld [vmem:[%s1050_s0 + $0x20] sm:$0xff]  ;;  %v41_v9 = vld [vmem:[%s1050_s0 + $0x28] sm:$0xff]  ;;  %v42_v11 = vld [vmem:[%s1050_s0 + $0x30] sm:$0xff]  ;;  %vm548_vm3 = vcmask 261312   ;;  %vm552_vm4 = vcmask 326912   ;;  %vm556_vm5 = vcmask 392512  }
   0x8   :  { %v54_v10 = vpack.c.bf16 %v41_v9, %v40_v8  ;;  %v43_v12 = vld [vmem:[%s1050_s0 + $0x38] sm:$0xff]  ;;  %v44_v14 = vld [vmem:[%s1050_s0 + $0x40] sm:$0xff]  ;;  %v45_v15 = vld [vmem:[%s1050_s0 + $0x48] sm:$0xff]  ;;  %vm560_vm6 = vcmask 458112   ;;  %vm564_vm7 = vcmask 523712   ;;  %vm568_vm8 = vcmask 589312  }
   0x9   :  { %v55_v13 = vpack.c.bf16 %v43_v12, %v42_v11  ;;  %v56_v16 = vpack.c.bf16 %v45_v15, %v44_v14  ;;  %v700_v17 = vld [vmem:[%s1053_s3 + $0x38] sm:$0xff]  ;;  %v46_v18 = vld [vmem:[%s1050_s0 + $0x50] sm:$0xff]  ;;  %v698_v22 = vld [vmem:[%s1053_s3 + $0x28] sm:$0xff]  ;;  %vm572_vm9 = vcmask 654912   ;;  %vm576_vm10 = vcmask 720512   ;;  %s607_s13 = sshll.u32 %s1059_s9, 4  ;;  %s608_s13 = int_to_ptr.hbm [resolvable:$true] %s607_s13 }
   0xa   :  { %238 = vmatpush.bf16.msra.mxu1 %v700_v17  ;;  %709 = vmatpush.bf16.msra.mxu3 %v700_v17  ;;  %v47_v19 = vld [vmem:[%s1050_s0 + $0x58] sm:$0xff]  ;;  %v699_v21 = vld [vmem:[%s1053_s3 + $0x30] sm:$0xff]  ;;  %v697_v23 = vld [vmem:[%s1053_s3 + $0x20] sm:$0xff]  ;;  %vm580_vm11 = vcmask 786112   ;;  %vm584_vm12 = vcmask 851712   ;;  %vm588_vm13 = vcmask 917312  }
   0xb   :  { %v57_v20 = vpack.c.bf16 %v47_v19, %v46_v18  ;;  %v48_v24 = vld [vmem:[%s1050_s0 + $0x60] sm:$0xff]  ;;  %v49_v25 = vld [vmem:[%s1050_s0 + $0x68] sm:$0xff]  ;;  %v696_v26 = vld [vmem:[%s1053_s3 + $0x18] sm:$0xff]  ;;  %vm592_vm14 = vcmask 982912   ;;  %vm596_vm15 = vcmask 1048512  }
   0xc   :  { %v58_v27 = vpack.c.bf16 %v49_v25, %v48_v24  ;;  %v695_v28 = vld [vmem:[%s1053_s3 + $0x10] sm:$0xff]  ;;  %v694_v29 = vld [vmem:[%s1053_s3 + $0x8] sm:$0xff]  ;;  %v693_v30 = vld [vmem:[%s1053_s3] sm:$0xff] }
   0xd   :  { %v50_v31 = vld [vmem:[%s1050_s0 + $0x70] sm:$0xff]  ;;  %v51_v32 = vld [vmem:[%s1050_s0 + $0x78] sm:$0xff]  ;;  %v899_v35 = vld [vmem:[%s1052_s2] ss:$0 sm:$0xff] }
   0xe   :  { %239 = vmatpush.bf16.msra.mxu1 %v699_v21  ;;  %710 = vmatpush.bf16.msra.mxu3 %v699_v21  ;;  %v59_v33 = vpack.c.bf16 %v51_v32, %v50_v31  ;;  %v707_v14 = vld [vmem:[%s1055_s5 + $0x30] sm:$0xff]  ;;  %v705_v17 = vld [vmem:[%s1055_s5 + $0x20] sm:$0xff]  ;;  %v704_v21 = vld [vmem:[%s1055_s5 + $0x18] sm:$0xff] }
   0xf   :  { %v703_v25 = vld [vmem:[%s1055_s5 + $0x10] sm:$0xff] }
  0x12   :  { %240 = vmatpush.bf16.msra.mxu1 %v698_v22  ;;  %711 = vmatpush.bf16.msra.mxu3 %v698_v22 }
  0x16   :  { %241 = vmatpush.bf16.msra.mxu1 %v697_v23  ;;  %712 = vmatpush.bf16.msra.mxu3 %v697_v23 }
  0x17   :  { %621 = vmatmul.msk.bf16.gmra.mxu0 %vm72_vm0, %v53_v7 }
  0x1a   :  { %242 = vmatpush.bf16.msra.mxu1 %v696_v26  ;;  %713 = vmatpush.bf16.msra.mxu3 %v696_v26 }
  0x1e   :  { %243 = vmatpush.bf16.msra.mxu1 %v695_v28  ;;  %714 = vmatpush.bf16.msra.mxu3 %v695_v28  ;;  %v701_v28 = vld [vmem:[%s1055_s5] sm:$0xff] }
  0x22   :  { %244 = vmatpush.bf16.msra.mxu1 %v694_v29  ;;  %715 = vmatpush.bf16.msra.mxu3 %v694_v29 }
  0x26   :  { %245 = vmatpush.bf16.msra.mxu1 %v693_v30  ;;  %716 = vmatpush.bf16.msra.mxu3 %v693_v30 }
  0x27   :  { %622 = vmatmul.msk.bf16.gmra.mxu0 %vm72_vm0, %v54_v10  ;;  %v708_v10 = vld [vmem:[%s1055_s5 + $0x38] sm:$0xff] }
  0x28   :  { %379 = vmatpush.bf16.msra.mxu2 %v708_v10 }
  0x2a   :  { %717 = vmatpush.bf16.msrb.mxu3 %v708_v10 }
  0x2c   :  { %380 = vmatpush.bf16.msra.mxu2 %v707_v14 }
  0x2e   :  { %718 = vmatpush.bf16.msrb.mxu3 %v707_v14 }
  0x37   :  { %623 = vmatmul.msk.bf16.gmra.mxu0 %vm72_vm0, %v55_v13 }
  0x47   :  { %624 = vmatmul.msk.bf16.gmra.mxu0 %vm72_vm0, %v56_v16  ;;  %v706_v16 = vld [vmem:[%s1055_s5 + $0x28] sm:$0xff] }
  0x48   :  { %381 = vmatpush.bf16.msra.mxu2 %v706_v16  ;;  %719 = vmatpush.bf16.msrb.mxu3 %v706_v16 }
  0x4c   :  { %382 = vmatpush.bf16.msra.mxu2 %v705_v17  ;;  %720 = vmatpush.bf16.msrb.mxu3 %v705_v17 }
  0x50   :  { %383 = vmatpush.bf16.msra.mxu2 %v704_v21  ;;  %721 = vmatpush.bf16.msrb.mxu3 %v704_v21 }
  0x54   :  { %384 = vmatpush.bf16.msra.mxu2 %v703_v25  ;;  %722 = vmatpush.bf16.msrb.mxu3 %v703_v25 }
  0x57   :  { %625 = vmatmul.msk.bf16.gmra.mxu0 %vm72_vm0, %v57_v20 }
  0x67   :  { %626 = vmatmul.msk.bf16.gmra.mxu0 %vm72_vm0, %v58_v27  ;;  %v702_v27 = vld [vmem:[%s1055_s5 + $0x8] sm:$0xff] }
  0x68   :  { %385 = vmatpush.bf16.msra.mxu2 %v702_v27  ;;  %723 = vmatpush.bf16.msrb.mxu3 %v702_v27 }
  0x6c   :  { %386 = vmatpush.bf16.msra.mxu2 %v701_v28  ;;  %724 = vmatpush.bf16.msrb.mxu3 %v701_v28 }
  0x77   :  { %627 = vmatmul.msk.bf16.gmra.mxu0 %vm72_vm0, %v59_v33 }
  0x84   :  { %v106_v34 = vpop.f32.mrf.mxu0 }
  0x85   :  { %v107_v36 = vadd.f32 %v899_v35, %v106_v34 }
  0x87   :  { %v146_v39 = vmax.f32 %v107_v36, 0.0 }
  0x8c   :  { %v108_v37 = vpop.f32.mrf.mxu0 }
  0x8d   :  { %v109_v38 = vadd.f32 %v899_v35, %v108_v37  ;;  %v944_v37 = vld [vmem:[%s1054_s4] ss:$0 sm:$0xff] }
  0x8f   :  { %v147_v40 = vmax.f32 %v109_v38, 0.0 }
  0x91   :  { %v162_v41 = vpack.c.bf16 %v147_v40, %v146_v39 }
  0x93   :  { %246 = vmatmul.bf16.vlgmr.msra.gmra.mxu1 %v162_v41 }
  0x94   :  { %v111_v42 = vpop.f32.mrf.mxu0 }
  0x95   :  { %v112_v43 = vadd.f32 %v899_v35, %v111_v42 }
  0x97   :  { %v148_v46 = vmax.f32 %v112_v43, 0.0 }
  0x9c   :  { %v113_v44 = vpop.f32.mrf.mxu0 }
  0x9d   :  { %v114_v45 = vadd.f32 %v899_v35, %v113_v44 }
  0x9f   :  { %v149_v47 = vmax.f32 %v114_v45, 0.0 }
  0xa1   :  { %v163_v48 = vpack.c.bf16 %v149_v47, %v148_v46 }
  0xa3   :  { %251 = vmatmul.bf16.gmra.mxu1 %v163_v48 }
  0xa4   :  { %v116_v49 = vpop.f32.mrf.mxu0 }
  0xa5   :  { %v117_v50 = vadd.f32 %v899_v35, %v116_v49 }
  0xa7   :  { %v150_v53 = vmax.f32 %v117_v50, 0.0 }
  0xac   :  { %v118_v51 = vpop.f32.mrf.mxu0 }
  0xad   :  { %v119_v52 = vadd.f32 %v899_v35, %v118_v51 }
  0xaf   :  { %v151_v54 = vmax.f32 %v119_v52, 0.0 }
  0xb1   :  { %v164_v55 = vpack.c.bf16 %v151_v54, %v150_v53 }
  0xb3   :  { %256 = vmatmul.bf16.gmra.mxu1 %v164_v55 }
  0xb4   :  { %v121_v56 = vpop.f32.mrf.mxu0 }
  0xb5   :  { %v122_v57 = vadd.f32 %v899_v35, %v121_v56 }
  0xb7   :  { %v152_v60 = vmax.f32 %v122_v57, 0.0 }
  0xbc   :  { %v123_v58 = vpop.f32.mrf.mxu0 }
  0xbd   :  { %v124_v59 = vadd.f32 %v899_v35, %v123_v58 }
  0xbf   :  { %v153_v61 = vmax.f32 %v124_v59, 0.0 }
  0xc1   :  { %v165_v62 = vpack.c.bf16 %v153_v61, %v152_v60 }
  0xc3   :  { %261 = vmatmul.bf16.gmra.mxu1 %v165_v62 }
  0xc4   :  { %v126_v63 = vpop.f32.mrf.mxu0 }
  0xc5   :  { %v127_v0 = vadd.f32 %v899_v35, %v126_v63 }
  0xc7   :  { %v154_v3 = vmax.f32 %v127_v0, 0.0 }
  0xcc   :  { %v128_v1 = vpop.f32.mrf.mxu0 }
  0xcd   :  { %v129_v2 = vadd.f32 %v899_v35, %v128_v1 }
  0xcf   :  { %v155_v4 = vmax.f32 %v129_v2, 0.0 }
  0xd1   :  { %v166_v5 = vpack.c.bf16 %v155_v4, %v154_v3  ;;  %v758_v4 = vmov 0  }
  0xd2   :  { %727 = vset.pattern.permute.xlu0 %v758_v4 }
  0xd3   :  { %266 = vmatmul.bf16.gmra.mxu1 %v166_v5 }
  0xd4   :  { %v131_v6 = vpop.f32.mrf.mxu0 }
  0xd5   :  { %v132_v7 = vadd.f32 %v899_v35, %v131_v6 }
  0xd7   :  { %v156_v11 = vmax.f32 %v132_v7, 0.0 }
  0xdc   :  { %v133_v8 = vpop.f32.mrf.mxu0 }
  0xdd   :  { %v134_v9 = vadd.f32 %v899_v35, %v133_v8  ;;  %v496_v8 = vld [vmem:[#allocation2] sm:$0x1] }
  0xde   :  { %499 = vperm.xlu0 %727, %v496_v8  }
  0xdf   :  { %v157_v12 = vmax.f32 %v134_v9, 0.0 }
  0xe1   :  { %v167_v13 = vpack.c.bf16 %v157_v12, %v156_v11 }
  0xe3   :  { %271 = vmatmul.bf16.gmra.mxu1 %v167_v13 }
  0xe4   :  { %v136_v15 = vpop.f32.mrf.mxu0 }
  0xe5   :  { %v137_v18 = vadd.f32 %v899_v35, %v136_v15 }
  0xe7   :  { %v158_v22 = vmax.f32 %v137_v18, 0.0 }
  0xec   :  { %v138_v19 = vpop.f32.mrf.mxu0 }
  0xed   :  { %v139_v20 = vadd.f32 %v899_v35, %v138_v19 }
  0xef   :  { %v159_v23 = vmax.f32 %v139_v20, 0.0 }
  0xf1   :  { %v168_v24 = vpack.c.bf16 %v159_v23, %v158_v22 }
  0xf3   :  { %276 = vmatmul.bf16.vlgmr.msra.gmra.mxu3 %v168_v24 }
  0xf4   :  { %v141_v26 = vpop.f32.mrf.mxu0 }
  0xf5   :  { %v142_v29 = vadd.f32 %v899_v35, %v141_v26 }
  0xf7   :  { %v160_v32 = vmax.f32 %v142_v29, 0.0 }
  0xfc   :  { %v143_v30 = vpop.f32.mrf.mxu0 }
  0xfd   :  { %v144_v31 = vadd.f32 %v899_v35, %v143_v30  ;;  %v965_v30 = vld [vmem:[%s1056_s6] ss:$0 sm:$0xff]  ;;  %s759_s6 = smov [#allocation3]  }
  0xff   :  { %v161_v33 = vmax.f32 %v144_v31, 0.0 }
 0x101   :  { %v169_v34 = vpack.c.bf16 %v161_v33, %v160_v32  ;;  %v971_v33 = vld [vmem:[%s1057_s7] ss:$0 sm:$0xff]  ;;  %s605_s7 = sshll.u32 %s759_s6, 4  ;;  %s606_s7 = int_to_ptr.vmem [resolvable:$true] %s605_s7 }
 0x103   :  { %281 = vmatmul.bf16.gmra.mxu3 %v169_v34 }
 0x110   :  { %v247_v36 = vpop.f32.mrf.mxu1 }
 0x111   :  { %v248_v38 = vadd.f32 %v944_v37, %v247_v36 }
 0x113   :  { %v287_v41 = vmax.f32 %v248_v38, 0.0 }
 0x118   :  { %v249_v39 = vpop.f32.mrf.mxu1 }
 0x119   :  { %v250_v40 = vadd.f32 %v944_v37, %v249_v39 }
 0x11b   :  { %v288_v42 = vmax.f32 %v250_v40, 0.0 }
 0x11d   :  { %v303_v43 = vpack.c.bf16 %v288_v42, %v287_v41 }
 0x11f   :  { %387 = vmatmul.bf16.vlgmr.msra.gmra.mxu2 %v303_v43 }
 0x120   :  { %v252_v35 = vpop.f32.mrf.mxu1 }
 0x121   :  { %v253_v44 = vadd.f32 %v944_v37, %v252_v35 }
 0x123   :  { %v289_v47 = vmax.f32 %v253_v44, 0.0 }
 0x128   :  { %v254_v45 = vpop.f32.mrf.mxu1 }
 0x129   :  { %v255_v46 = vadd.f32 %v944_v37, %v254_v45 }
 0x12b   :  { %v290_v48 = vmax.f32 %v255_v46, 0.0 }
 0x12d   :  { %v304_v49 = vpack.c.bf16 %v290_v48, %v289_v47 }
 0x12f   :  { %392 = vmatmul.bf16.gmra.mxu2 %v304_v49 }
 0x130   :  { %v257_v50 = vpop.f32.mrf.mxu1 }
 0x131   :  { %v258_v51 = vadd.f32 %v944_v37, %v257_v50 }
 0x133   :  { %v291_v54 = vmax.f32 %v258_v51, 0.0 }
 0x138   :  { %v259_v52 = vpop.f32.mrf.mxu1 }
 0x139   :  { %v260_v53 = vadd.f32 %v944_v37, %v259_v52 }
 0x13b   :  { %v292_v55 = vmax.f32 %v260_v53, 0.0 }
 0x13d   :  { %v305_v56 = vpack.c.bf16 %v292_v55, %v291_v54 }
 0x13f   :  { %397 = vmatmul.bf16.gmra.mxu2 %v305_v56 }
 0x140   :  { %v262_v57 = vpop.f32.mrf.mxu1 }
 0x141   :  { %v263_v58 = vadd.f32 %v944_v37, %v262_v57 }
 0x143   :  { %v293_v61 = vmax.f32 %v263_v58, 0.0 }
 0x148   :  { %v264_v59 = vpop.f32.mrf.mxu1 }
 0x149   :  { %v265_v60 = vadd.f32 %v944_v37, %v264_v59 }
 0x14b   :  { %v294_v62 = vmax.f32 %v265_v60, 0.0 }
 0x14d   :  { %v306_v63 = vpack.c.bf16 %v294_v62, %v293_v61 }
 0x14f   :  { %402 = vmatmul.bf16.gmra.mxu2 %v306_v63 }
 0x150   :  { %v267_v0 = vpop.f32.mrf.mxu1 }
 0x151   :  { %v268_v1 = vadd.f32 %v944_v37, %v267_v0 }
 0x153   :  { %v295_v5 = vmax.f32 %v268_v1, 0.0 }
 0x158   :  { %v269_v2 = vpop.f32.mrf.mxu1 }
 0x159   :  { %v270_v3 = vadd.f32 %v944_v37, %v269_v2 }
 0x15b   :  { %v296_v6 = vmax.f32 %v270_v3, 0.0 }
 0x15d   :  { %v307_v7 = vpack.c.bf16 %v296_v6, %v295_v5 }
 0x15f   :  { %407 = vmatmul.bf16.gmra.mxu2 %v307_v7 }
 0x160   :  { %v272_v9 = vpop.f32.mrf.mxu1 }
 0x161   :  { %v273_v10 = vadd.f32 %v944_v37, %v272_v9 }
 0x163   :  { %v297_v13 = vmax.f32 %v273_v10, 0.0 }
 0x168   :  { %v274_v11 = vpop.f32.mrf.mxu1 }
 0x169   :  { %v275_v12 = vadd.f32 %v944_v37, %v274_v11 }
 0x16b   :  { %v298_v14 = vmax.f32 %v275_v12, 0.0 }
 0x16d   :  { %v308_v15 = vpack.c.bf16 %v298_v14, %v297_v13 }
 0x16f   :  { %412 = vmatmul.bf16.gmra.mxu2 %v308_v15 }
 0x176   :  { %v277_v16 = vpop.f32.mrf.mxu3 }
 0x177   :  { %v278_v17 = vadd.f32 %v944_v37, %v277_v16 }
 0x179   :  { %v299_v20 = vmax.f32 %v278_v17, 0.0 }
 0x17e   :  { %v279_v18 = vpop.f32.mrf.mxu3 }
 0x17f   :  { %v280_v19 = vadd.f32 %v944_v37, %v279_v18 }
 0x181   :  { %v300_v21 = vmax.f32 %v280_v19, 0.0 }
 0x183   :  { %v309_v22 = vpack.c.bf16 %v300_v21, %v299_v20 }
 0x185   :  { %417 = vmatmul.bf16.vlgmr.msrb.gmra.mxu3 %v309_v22 }
 0x186   :  { %v282_v23 = vpop.f32.mrf.mxu3 }
 0x187   :  { %v283_v24 = vadd.f32 %v944_v37, %v282_v23 }
 0x189   :  { %v301_v27 = vmax.f32 %v283_v24, 0.0 }
 0x18e   :  { %v284_v25 = vpop.f32.mrf.mxu3 }
 0x18f   :  { %v285_v26 = vadd.f32 %v944_v37, %v284_v25 }
 0x191   :  { %v302_v28 = vmax.f32 %v285_v26, 0.0 }
 0x193   :  { %v310_v29 = vpack.c.bf16 %v302_v28, %v301_v27 }
 0x195   :  { %422 = vmatmul.bf16.gmra.mxu3 %v310_v29 }
 0x1a2   :  { %v388_v31 = vpop.f32.mrf.mxu2 }
 0x1a3   :  { %v389_v32 = vadd.f32 %v965_v30, %v388_v31 }
 0x1a5   :  { %v428_v34 = vmax.f32 %v389_v32, 0.0 }
 0x1a7   :  { %v448_v36 = vmul.f32 %v971_v33, %v428_v34 }
 0x1a9   :  { %464 = vadd.xlane.f32.xlu0 %v448_v36 }
 0x1aa   :  { %v390_v37 = vpop.f32.mrf.mxu2 }
 0x1ab   :  { %v391_v38 = vadd.f32 %v965_v30, %v390_v37 }
 0x1ad   :  { %v429_v39 = vmax.f32 %v391_v38, 0.0 }
 0x1af   :  { %v449_v40 = vmul.f32 %v971_v33, %v429_v39 }
 0x1b1   :  { %466 = vadd.xlane.f32.xlu1 %v449_v40 }
 0x1b2   :  { %v393_v41 = vpop.f32.mrf.mxu2 }
 0x1b3   :  { %v394_v42 = vadd.f32 %v965_v30, %v393_v41 }
 0x1b5   :  { %v430_v43 = vmax.f32 %v394_v42, 0.0  ;;  %v500_v42 = vpop.permute.xlu0 %499 }
 0x1b7   :  { %v450_v35 = vmul.f32 %v971_v33, %v430_v43 }
 0x1b9   :  { %468 = vadd.xlane.f32.xlu1 %v450_v35  ;;  %v535_v35 = vlaneseq }
 0x1ba   :  { %v395_v44 = vpop.f32.mrf.mxu2 }
 0x1bb   :  { %v396_v45 = vadd.f32 %v965_v30, %v395_v44 }
 0x1bd   :  { %v431_v46 = vmax.f32 %v396_v45, 0.0 }
 0x1bf   :  { %v451_v47 = vmul.f32 %v971_v33, %v431_v46  ;;  %v1004_v46 = vperm.slane %v500_v42, 0 }
 0x1c1   :  { %470 = vadd.xlane.f32.xlu2 %v451_v47  ;;  %v1006_v47 = vand.u32 127, %v535_v35 }
 0x1c2   :  { %v398_v48 = vpop.f32.mrf.mxu2 }
 0x1c3   :  { %v399_v49 = vadd.f32 %v965_v30, %v398_v48  ;;  %v594_v42 = vadd.s32 4294967176, %v1006_v47 }
 0x1c5   :  { %v432_v50 = vmax.f32 %v399_v49, 0.0 }
 0x1c7   :  { %v452_v51 = vmul.f32 %v971_v33, %v432_v50  ;;  %v542_v50 = vadd.s32 4294967280, %v1006_v47 }
 0x1c9   :  { %472 = vadd.xlane.f32.xlu2 %v452_v51 }
 0x1ca   :  { %v400_v52 = vpop.f32.mrf.mxu2 }
 0x1cb   :  { %v401_v53 = vadd.f32 %v965_v30, %v400_v52  ;;  %v546_v52 = vadd.s32 4294967272, %v1006_v47 }
 0x1cd   :  { %v433_v54 = vmax.f32 %v401_v53, 0.0 }
 0x1cf   :  { %v453_v55 = vmul.f32 %v971_v33, %v433_v54 }
 0x1d1   :  { %474 = vadd.xlane.f32.xlu1 %v453_v55 }
 0x1d2   :  { %v403_v56 = vpop.f32.mrf.mxu2 }
 0x1d3   :  { %v404_v57 = vadd.f32 %v965_v30, %v403_v56  ;;  %v550_v56 = vadd.s32 4294967264, %v1006_v47 }
 0x1d5   :  { %v434_v58 = vmax.f32 %v404_v57, 0.0 }
 0x1d7   :  { %v454_v59 = vmul.f32 %v971_v33, %v434_v58 }
 0x1d9   :  { %476 = vadd.xlane.f32.xlu2 %v454_v59 }
 0x1da   :  { %v405_v60 = vpop.f32.mrf.mxu2 }
 0x1db   :  { %v406_v61 = vadd.f32 %v965_v30, %v405_v60 }
 0x1dd   :  { %v435_v62 = vmax.f32 %v406_v61, 0.0 }
 0x1df   :  { %v455_v63 = vmul.f32 %v971_v33, %v435_v62  ;;  %v554_v62 = vadd.s32 4294967256, %v1006_v47 }
 0x1e1   :  { %478 = vadd.xlane.f32.xlu1 %v455_v63 }
 0x1e2   :  { %v408_v0 = vpop.f32.mrf.mxu2 }
 0x1e3   :  { %v409_v1 = vadd.f32 %v965_v30, %v408_v0 }
 0x1e5   :  { %v436_v2 = vmax.f32 %v409_v1, 0.0  ;;  %v558_v1 = vadd.s32 4294967248, %v1006_v47 }
 0x1e7   :  { %v456_v3 = vmul.f32 %v971_v33, %v436_v2 }
 0x1e9   :  { %480 = vadd.xlane.f32.xlu2 %v456_v3 }
 0x1ea   :  { %v410_v4 = vpop.f32.mrf.mxu2 }
 0x1eb   :  { %v411_v5 = vadd.f32 %v965_v30, %v410_v4  ;;  %v562_v4 = vadd.s32 4294967240, %v1006_v47 }
 0x1ed   :  { %v437_v6 = vmax.f32 %v411_v5, 0.0 }
 0x1ef   :  { %v457_v7 = vmul.f32 %v971_v33, %v437_v6 }
 0x1f1   :  { %482 = vadd.xlane.f32.xlu1 %v457_v7  ;;  %v566_v7 = vadd.s32 4294967232, %v1006_v47 }
 0x1f2   :  { %v413_v8 = vpop.f32.mrf.mxu2 }
 0x1f3   :  { %v414_v9 = vadd.f32 %v965_v30, %v413_v8 }
 0x1f5   :  { %v438_v10 = vmax.f32 %v414_v9, 0.0 }
 0x1f7   :  { %v458_v11 = vmul.f32 %v971_v33, %v438_v10 }
 0x1f9   :  { %484 = vadd.xlane.f32.xlu2 %v458_v11  ;;  %v570_v11 = vadd.s32 4294967224, %v1006_v47 }
 0x1fa   :  { %v415_v12 = vpop.f32.mrf.mxu2 }
 0x1fb   :  { %v416_v13 = vadd.f32 %v965_v30, %v415_v12 }
 0x1fd   :  { %v439_v14 = vmax.f32 %v416_v13, 0.0 }
 0x1ff   :  { %v459_v15 = vmul.f32 %v971_v33, %v439_v14  ;;  %v574_v14 = vadd.s32 4294967216, %v1006_v47 }
 0x201   :  { %486 = vadd.xlane.f32.xlu1 %v459_v15 }
 0x208   :  { %v418_v16 = vpop.f32.mrf.mxu3 }
 0x209   :  { %v419_v17 = vadd.f32 %v965_v30, %v418_v16 }
 0x20b   :  { %v440_v18 = vmax.f32 %v419_v17, 0.0 }
 0x20d   :  { %v460_v19 = vmul.f32 %v971_v33, %v440_v18 }
 0x20f   :  { %488 = vadd.xlane.f32.xlu2 %v460_v19  ;;  %v578_v19 = vadd.s32 4294967208, %v1006_v47 }
 0x210   :  { %v420_v20 = vpop.f32.mrf.mxu3 }
 0x211   :  { %v421_v21 = vadd.f32 %v965_v30, %v420_v20 }
 0x213   :  { %v441_v22 = vmax.f32 %v421_v21, 0.0 }
 0x215   :  { %v461_v23 = vmul.f32 %v971_v33, %v441_v22 }
 0x217   :  { %490 = vadd.xlane.f32.xlu1 %v461_v23  ;;  %v582_v23 = vadd.s32 4294967200, %v1006_v47 }
 0x218   :  { %v423_v24 = vpop.f32.mrf.mxu3 }
 0x219   :  { %v424_v25 = vadd.f32 %v965_v30, %v423_v24 }
 0x21b   :  { %v442_v26 = vmax.f32 %v424_v25, 0.0 }
 0x21d   :  { %v462_v27 = vmul.f32 %v971_v33, %v442_v26 }
 0x21f   :  { %492 = vadd.xlane.f32.xlu2 %v462_v27  ;;  %v586_v27 = vadd.s32 4294967192, %v1006_v47 }
 0x220   :  { %v425_v28 = vpop.f32.mrf.mxu3 }
 0x221   :  { %v426_v29 = vadd.f32 %v965_v30, %v425_v28  ;;  %v465_v30 = vpop.xlane.xlu0 %464 }
 0x222   :  { %v503_v49 = vadd.f32 %v1004_v46, %v465_v30 }
 0x223   :  { %v443_v31 = vmax.f32 %v426_v29, 0.0 }
 0x224   :  { %v467_v34 = vpop.xlane.xlu1 %466  ;;  %v537_v59 = vperm.slane %v503_v49, %v1006_v47 }
 0x225   :  { %v463_v32 = vmul.f32 %v971_v33, %v443_v31  ;;  %v538_v33 = vadd.s32 4294967288, %v1006_v47  ;;  %v504_v48 = vadd.f32 %v1004_v46, %v467_v34 }
 0x227   :  { %494 = vadd.xlane.f32.xlu0 %v463_v32  ;;  %v539_v54 = vperm.slane %v504_v48, %v538_v33  ;;  %v590_v32 = vadd.s32 4294967184, %v1006_v47 }
 0x229   :  { %v541_v0 = vsel %vm540_vm1, %v539_v54, %v537_v59 }
 0x22c   :  { %v469_v37 = vpop.xlane.xlu1 %468 }
 0x22d   :  { %v505_v51 = vadd.f32 %v1004_v46, %v469_v37 }
 0x22f   :  { %v543_v60 = vperm.slane %v505_v51, %v542_v50 }
 0x231   :  { %v545_v6 = vsel %vm544_vm2, %v543_v60, %v541_v0 }
 0x234   :  { %v471_v36 = vpop.xlane.xlu2 %470 }
 0x235   :  { %v506_v53 = vadd.f32 %v1004_v46, %v471_v36 }
 0x237   :  { %v547_v61 = vperm.slane %v506_v53, %v546_v52 }
 0x239   :  { %v549_v9 = vsel %vm548_vm3, %v547_v61, %v545_v6 }
 0x23c   :  { %v473_v38 = vpop.xlane.xlu2 %472 }
 0x23d   :  { %v507_v57 = vadd.f32 %v1004_v46, %v473_v38 }
 0x23f   :  { %v551_v3 = vperm.slane %v507_v57, %v550_v56 }
 0x241   :  { %v553_v17 = vsel %vm552_vm4, %v551_v3, %v549_v9 }
 0x244   :  { %v475_v39 = vpop.xlane.xlu1 %474 }
 0x245   :  { %v508_v63 = vadd.f32 %v1004_v46, %v475_v39 }
 0x247   :  { %v555_v10 = vperm.slane %v508_v63, %v554_v62 }
 0x249   :  { %v557_v25 = vsel %vm556_vm5, %v555_v10, %v553_v17 }
 0x24c   :  { %v477_v40 = vpop.xlane.xlu2 %476 }
 0x24d   :  { %v509_v2 = vadd.f32 %v1004_v46, %v477_v40 }
 0x24f   :  { %v559_v13 = vperm.slane %v509_v2, %v558_v1 }
 0x251   :  { %v561_v29 = vsel %vm560_vm6, %v559_v13, %v557_v25 }
 0x254   :  { %v479_v41 = vpop.xlane.xlu1 %478 }
 0x255   :  { %v510_v5 = vadd.f32 %v1004_v46, %v479_v41 }
 0x257   :  { %v563_v18 = vperm.slane %v510_v5, %v562_v4 }
 0x259   :  { %v565_v36 = vsel %vm564_vm7, %v563_v18, %v561_v29 }
 0x25c   :  { %v481_v43 = vpop.xlane.xlu2 %480 }
 0x25d   :  { %v511_v8 = vadd.f32 %v1004_v46, %v481_v43 }
 0x25f   :  { %v567_v22 = vperm.slane %v511_v8, %v566_v7 }
 0x261   :  { %v569_v38 = vsel %vm568_vm8, %v567_v22, %v565_v36 }
 0x264   :  { %v483_v44 = vpop.xlane.xlu1 %482 }
 0x265   :  { %v512_v12 = vadd.f32 %v1004_v46, %v483_v44 }
 0x267   :  { %v571_v26 = vperm.slane %v512_v12, %v570_v11 }
 0x269   :  { %v573_v40 = vsel %vm572_vm9, %v571_v26, %v569_v38 }
 0x26c   :  { %v485_v45 = vpop.xlane.xlu2 %484 }
 0x26d   :  { %v513_v15 = vadd.f32 %v1004_v46, %v485_v45 }
 0x26f   :  { %v575_v31 = vperm.slane %v513_v15, %v574_v14 }
 0x271   :  { %v577_v43 = vsel %vm576_vm10, %v575_v31, %v573_v40 }
 0x274   :  { %v487_v55 = vpop.xlane.xlu1 %486 }
 0x275   :  { %v514_v20 = vadd.f32 %v1004_v46, %v487_v55 }
 0x277   :  { %v579_v37 = vperm.slane %v514_v20, %v578_v19 }
 0x279   :  { %v581_v45 = vsel %vm580_vm11, %v579_v37, %v577_v43 }
 0x282   :  { %v489_v58 = vpop.xlane.xlu2 %488 }
 0x283   :  { %v515_v24 = vadd.f32 %v1004_v46, %v489_v58 }
 0x285   :  { %v583_v39 = vperm.slane %v515_v24, %v582_v23 }
 0x287   :  { %v585_v33 = vsel %vm584_vm12, %v583_v39, %v581_v45 }
 0x28a   :  { %v491_v16 = vpop.xlane.xlu1 %490 }
 0x28b   :  { %v516_v28 = vadd.f32 %v1004_v46, %v491_v16 }
 0x28d   :  { %v587_v41 = vperm.slane %v516_v28, %v586_v27 }
 0x28f   :  { %v589_v48 = vsel %vm588_vm13, %v587_v41, %v585_v33 }
 0x292   :  { %v493_v21 = vpop.xlane.xlu2 %492 }
 0x293   :  { %v517_v34 = vadd.f32 %v1004_v46, %v493_v21 }
 0x295   :  { %v591_v35 = vperm.slane %v517_v34, %v590_v32 }
 0x297   :  { %v593_v50 = vsel %vm592_vm14, %v591_v35, %v589_v48 }
 0x29a   :  { %v495_v44 = vpop.xlane.xlu0 %494 }
 0x29b   :  { %v518_v30 = vadd.f32 %v1004_v46, %v495_v44 }
 0x29d   :  { %v595_v49 = vperm.slane %v518_v30, %v594_v42 }
 0x29f   :  { %v597_v47 = vsel %vm596_vm15, %v595_v49, %v593_v50 }
 0x2a0   :  { %599 = vst [vmem:[#allocation3] sm:$0x1] %v597_v47 }
 0x2a1   :  { %610 = dma.vmem_to_hbm [thread:$0]  %s606_s7, 16, %s608_s13, [#allocation4]  }
 0x2a2   :  { %756 = dma.done.wait [#allocation4], 16  }
 0x2a3   :  { %757 = vsyncadd [#allocation4], 4294967280 }
 0x2a4   :  { %615 = vsyncpa [#allocation4], 1 }

</bundles_post_ra>
